<compile_context>
chip_gen: v7x
topology: tpu7x:2x2x1
jax: 0.10.0
libtpu: 0.0.40
codegen_flags: <defaults>
</compile_context>

<pallas_src>
import jax
import jax.numpy as jnp
from jax.experimental import pallas as pl
from jax.experimental.pallas import tpu as pltpu


# --------------------------- one-time parameter prep -----------------------

def prepare_params(params, C, H, compute_dtype=jnp.float32):
    """Fold the whole network into 5 matmul weights + 5 (1, width) bias rows.

    * 1x1 convs become channel-major block matmuls kron(w, I_Ho): activation
      lane index = channel*Ho + position, which matches both the raw strided
      input reshape and PyTorch's NCHW Flatten -> zero runtime transposes.
    * The nav branch rides along as extra lanes: blockdiag with wn in layer 1
      and identity blocks (zero bias) in layers 2/3.
    * The Q head consumes [conv_flat | nav] with vstack([wq1c, wq1n]).
    """
    (w1, b1, w2, b2, w3, b3, wn, bn, wq1c, wq1n, bq1, wq2, bq2) = params
    Ho = (H - 1) // 2 + 1                        # conv1 stride=2 output length
    h1 = wn.shape[1]

    eye_p = jnp.eye(Ho, dtype=jnp.float32)
    eye_n = jnp.eye(h1, dtype=jnp.float32)

    # channel-major 1x1-conv matmuls: row/col index = channel*Ho + position
    W1cm = jnp.kron(w1, eye_p)                   # (C*Ho,   oc1*Ho)
    W2cm = jnp.kron(w2, eye_p)                   # (oc1*Ho, oc2*Ho)
    W3cm = jnp.kron(w3, eye_p)                   # (oc2*Ho, oc2*Ho)

    def blockdiag(a, b):
        return jnp.block(
            [[a, jnp.zeros((a.shape[0], b.shape[1]), jnp.float32)],
             [jnp.zeros((b.shape[0], a.shape[1]), jnp.float32), b]])

    W1f = blockdiag(W1cm, wn)                    # (C*Ho+nav, oc1*Ho+h1)
    W2f = blockdiag(W2cm, eye_n)                 # nav lanes pass through
    W3f = blockdiag(W3cm, eye_n)
    Wq1 = jnp.concatenate([wq1c, wq1n], axis=0)  # (oc2*Ho+h1, h2), no permute
    Wq2 = wq2                                    # (h2, n_actions)

    zeros_h1 = jnp.zeros((h1,), jnp.float32)
    b1f = jnp.concatenate([jnp.repeat(b1[0], Ho), bn[0]])[None, :]
    b2f = jnp.concatenate([jnp.repeat(b2[0], Ho), zeros_h1])[None, :]
    b3f = jnp.concatenate([jnp.repeat(b3[0], Ho), zeros_h1])[None, :]
    bq1f = bq1.astype(jnp.float32)               # (1, h2)
    bq2f = bq2.astype(jnp.float32)               # (1, n_actions)

    weights = tuple(w.astype(compute_dtype) for w in (W1f, W2f, W3f, Wq1, Wq2))
    biases = (b1f, b2f, b3f, bq1f, bq2f)         # bias/ReLU stay f32 (v5e VPU)
    return weights + biases


# ------------------------------ fused kernel --------------------------------

def _fused_kernel(z_ref, w1_ref, w2_ref, w3_ref, wq1_ref, wq2_ref,
                  b1_ref, b2_ref, b3_ref, bq1_ref, bq2_ref, out_ref):
    cdt = w1_ref.dtype                            # matmul operand dtype
    h = jnp.dot(z_ref[...], w1_ref[...], preferred_element_type=jnp.float32)
    h = jnp.maximum(h + b1_ref[...], 0.0)         # [conv1 | nav] lanes
    h = jnp.dot(h.astype(cdt), w2_ref[...], preferred_element_type=jnp.float32)
    h = jnp.maximum(h + b2_ref[...], 0.0)         # nav lanes ride along (id blk)
    h = jnp.dot(h.astype(cdt), w3_ref[...], preferred_element_type=jnp.float32)
    h = jnp.maximum(h + b3_ref[...], 0.0)         # = [NCHW-flat conv | nav]
    q = jnp.dot(h.astype(cdt), wq1_ref[...], preferred_element_type=jnp.float32)
    q = jnp.maximum(q + bq1_ref[...], 0.0)
    out_ref[...] = (jnp.dot(q.astype(cdt), wq2_ref[...],
                            preferred_element_type=jnp.float32)
                    + bq2_ref[...])


# ------------------------------ fused forward --------------------------------

def network_forward(x_image, x_nav, prepped):
    """x_image: (B, C, H) f32, x_nav: (B, nav_dim) f32 -> (B, n_actions) f32."""
    (W1f, W2f, W3f, Wq1, Wq2, b1f, b2f, b3f, bq1f, bq2f) = prepped
    B, C, H = x_image.shape
    Ho = (H - 1) // 2 + 1
    d0 = W1f.shape[0]
    d1 = W1f.shape[1]
    d2 = W2f.shape[1]
    d3 = W3f.shape[1]
    h2 = Wq1.shape[1]
    na = Wq2.shape[1]
    cdt = W1f.dtype

    # conv1 stride=2 subsample; the channel-major flatten is a plain reshape so
    # no transposed XLA copy remains in front of the kernel.
    # TODO(synk): fold the stride-2 subsample in-kernel with a strided pl.ds
    # load on the lane axis if this slice ever shows up in profiles.
    img_flat = x_image[:, :, ::2].reshape(B, C * Ho)             # (B, C*Ho)
    z = jnp.concatenate([img_flat, x_nav], axis=1).astype(cdt)   # (B, d0)

    # Batch tiling: pad rows to a multiple of 8 (sublane), bounded-but-large TM
    # so per-step overhead amortizes and big batches shard across TensorCores.
    Bp = ((B + 7) // 8) * 8
    if Bp != B:
        z = jnp.pad(z, ((0, Bp - B), (0, 0)))
    TM = min(Bp, 1024)
    grid = (pl.cdiv(Bp, TM),)   # ragged last block (if any) is masked by Pallas

    flops = 2 * Bp * (d0 * d1 + d1 * d2 + d2 * d3 + d3 * h2 + h2 * na)
    operands = (z, W1f, W2f, W3f, Wq1, Wq2, b1f, b2f, b3f, bq1f, bq2f)
    bytes_accessed = int(sum(a.size * a.dtype.itemsize for a in operands)
                         + Bp * na * 4)

    def row_spec(width):
        return pl.BlockSpec((TM, width), lambda i: (i, 0))

    def full_spec(a):
        return pl.BlockSpec(a.shape, lambda i: (0, 0))

    out = pl.pallas_call(
        _fused_kernel,
        out_shape=jax.ShapeDtypeStruct((Bp, na), jnp.float32),
        grid=grid,
        in_specs=[row_spec(d0),
                  full_spec(W1f), full_spec(W2f), full_spec(W3f),
                  full_spec(Wq1), full_spec(Wq2),
                  full_spec(b1f), full_spec(b2f), full_spec(b3f),
                  full_spec(bq1f), full_spec(bq2f)],
        out_specs=pl.BlockSpec((TM, na), lambda i: (i, 0)),
        compiler_params=pltpu.CompilerParams(
            dimension_semantics=("parallel",)),
        cost_estimate=pl.CostEstimate(flops=flops, transcendentals=0,
                                      bytes_accessed=bytes_accessed),
    )(*operands)
    return out[:B]


# --------------------------- reference (plain JAX) --------------------------

def network_forward_ref(x_image, x_nav, params):
    (w1, b1, w2, b2, w3, b3, wn, bn, wq1c, wq1n, bq1, wq2, bq2) = params
    B = x_image.shape[0]
    xs = x_image[:, :, ::2]
    x = jnp.transpose(xs, (0, 2, 1))              # (B, Ho, C)
    h = jax.nn.relu(x @ w1 + b1[0])
    h = jax.nn.relu(h @ w2 + b2[0])
    h = jax.nn.relu(h @ w3 + b3[0])               # (B, Ho, oc2)
    conv_flat = jnp.transpose(h, (0, 2, 1)).reshape(B, -1)   # NCHW Flatten
    nav = jax.nn.relu(x_nav @ wn + bn[0])
    q = jax.nn.relu(conv_flat @ wq1c + nav @ wq1n + bq1[0])
    return q @ wq2 + bq2[0]


# ------------------------------- main ----------------------------------------

if __name__ == "__main__":
    # config (small, consistent with the module):
    B = 2
    C, H, W = 4, 16, 1          # input_shape[0] = (C, H, W); W=1 from unsqueeze(-1)
    nav_dim = 8                 # input_shape[1]
    oc1, oc2 = 8, 8             # out_channel1, out_channel2
    h1, h2 = 32, 32             # hidden_size1, hidden_size2
    n_actions = 4
    Ho = (H - 1) // 2 + 1       # conv1 stride=2 -> 8
    conv_out_size = oc2 * Ho * 1

    key = jax.random.PRNGKey(0)
    ks = jax.random.split(key, 16)

    def init(k, shape, scale=0.1):
        return jax.random.normal(k, shape, dtype=jnp.float32) * scale

    # Conv2d 1x1 weights stored directly as (in_ch, out_ch) matmul matrices.
    w1 = init(ks[0], (C, oc1));   b1 = init(ks[1], (1, oc1))
    w2 = init(ks[2], (oc1, oc2)); b2 = init(ks[3], (1, oc2))
    w3 = init(ks[4], (oc2, oc2)); b3 = init(ks[5], (1, oc2))
    # InitLinear(nav_dim, h1)
    wn = init(ks[6], (nav_dim, h1)); bn = init(ks[7], (1, h1))
    # InitLinear(h1 + conv_out_size, h2), split into conv / nav blocks
    wq1c = init(ks[8], (conv_out_size, h2))
    wq1n = init(ks[9], (h1, h2))
    bq1 = init(ks[10], (1, h2))
    # InitLinear(h2, n_actions)
    wq2 = init(ks[11], (h2, n_actions)); bq2 = init(ks[12], (1, n_actions))

    params = (w1, b1, w2, b2, w3, b3, wn, bn, wq1c, wq1n, bq1, wq2, bq2)

    x_image = jax.random.normal(ks[13], (B, C, H), dtype=jnp.float32)
    x_nav = jax.random.normal(ks[14], (B, nav_dim), dtype=jnp.float32)

    ref = jax.block_until_ready(network_forward_ref(x_image, x_nav, params))
    fwd = jax.jit(network_forward)

    # f32 path: bit-for-bit comparable to the reference.
    prepped_f32 = prepare_params(params, C, H, compute_dtype=jnp.float32)
    out_f32 = jax.block_until_ready(fwd(x_image, x_nav, prepped_f32))
    assert out_f32.shape == (B, n_actions), out_f32.shape
    assert jnp.allclose(out_f32, ref, atol=1e-5, rtol=1e-5), (out_f32, ref)

    # bf16 matmul-operand path (halved weight/activation DMA; f32 MXU
    # accumulation, f32 bias+ReLU) -- the v6e/v7x configuration from the
    # perf review; verified against the f32 reference at relaxed tolerance.
    prepped_bf16 = prepare_params(params, C, H, compute_dtype=jnp.bfloat16)
    out_bf16 = jax.block_until_ready(fwd(x_image, x_nav, prepped_bf16))
    assert jnp.allclose(out_bf16, ref, atol=5e-2, rtol=5e-2), (out_bf16, ref)

    print("KERNEL_OK")
</pallas_src>

<mosaic_0001>
module attributes {stable_mosaic.version = 11 : i64} {
  func.func @_fused_kernel(%arg0: i32, %arg1: memref<8x40xf32, #tpu.memory_space<vmem>>, %arg2: memref<40x96xf32, #tpu.memory_space<vmem>>, %arg3: memref<96x96xf32, #tpu.memory_space<vmem>>, %arg4: memref<96x96xf32, #tpu.memory_space<vmem>>, %arg5: memref<96x32xf32, #tpu.memory_space<vmem>>, %arg6: memref<32x4xf32, #tpu.memory_space<vmem>>, %arg7: memref<1x96xf32, #tpu.memory_space<vmem>>, %arg8: memref<1x96xf32, #tpu.memory_space<vmem>>, %arg9: memref<1x96xf32, #tpu.memory_space<vmem>>, %arg10: memref<1x32xf32, #tpu.memory_space<vmem>>, %arg11: memref<1x4xf32, #tpu.memory_space<vmem>>, %arg12: memref<8x4xf32, #tpu.memory_space<vmem>>) attributes {dimension_semantics = [#tpu.dimension_semantics<parallel>], iteration_bounds = array<i64: 1>, scalar_prefetch = 0 : i64, scratch_operands = 0 : i64, tpu.core_type = #tpu.core_type<tc>, window_params = [{transform_indices = @transform_0, window_bounds = array<i64: 8, 40>}, {pipeline_mode = #tpu.pipeline_mode<synchronous>, transform_indices = @transform_1, window_bounds = array<i64: 40, 96>}, {pipeline_mode = #tpu.pipeline_mode<synchronous>, transform_indices = @transform_2, window_bounds = array<i64: 96, 96>}, {pipeline_mode = #tpu.pipeline_mode<synchronous>, transform_indices = @transform_3, window_bounds = array<i64: 96, 96>}, {pipeline_mode = #tpu.pipeline_mode<synchronous>, transform_indices = @transform_4, window_bounds = array<i64: 96, 32>}, {pipeline_mode = #tpu.pipeline_mode<synchronous>, transform_indices = @transform_5, window_bounds = array<i64: 32, 4>}, {pipeline_mode = #tpu.pipeline_mode<synchronous>, transform_indices = @transform_6, window_bounds = array<i64: 1, 96>}, {pipeline_mode = #tpu.pipeline_mode<synchronous>, transform_indices = @transform_7, window_bounds = array<i64: 1, 96>}, {pipeline_mode = #tpu.pipeline_mode<synchronous>, transform_indices = @transform_8, window_bounds = array<i64: 1, 96>}, {pipeline_mode = #tpu.pipeline_mode<synchronous>, transform_indices = @transform_9, window_bounds = array<i64: 1, 32>}, {pipeline_mode = #tpu.pipeline_mode<synchronous>, transform_indices = @transform_10, window_bounds = array<i64: 1, 4>}, {transform_indices = @transform_11, window_bounds = array<i64: 8, 4>}]} {
    %c0 = arith.constant 0 : index
    %c0_0 = arith.constant 0 : index
    %0 = vector.load %arg1[%c0, %c0_0] : memref<8x40xf32, #tpu.memory_space<vmem>>, vector<8x40xf32>
    %c0_1 = arith.constant 0 : index
    %c0_2 = arith.constant 0 : index
    %1 = vector.load %arg2[%c0_1, %c0_2] : memref<40x96xf32, #tpu.memory_space<vmem>>, vector<40x96xf32>
    %cst = arith.constant dense<0.000000e+00> : vector<8x96xf32>
    %2 = tpu.matmul %0, %1, %cst {dimension_numbers = #tpu.dot_dimension_numbers<[1], [0], [0], [1], [0, 0, 1, 1], [], []>} : vector<8x40xf32>, vector<40x96xf32>, vector<8x96xf32> -> vector<8x96xf32>
    %c0_3 = arith.constant 0 : index
    %c0_4 = arith.constant 0 : index
    %3 = vector.load %arg7[%c0_3, %c0_4] : memref<1x96xf32, #tpu.memory_space<vmem>>, vector<1x96xf32>
    %4 = vector.broadcast %3 : vector<1x96xf32> to vector<8x96xf32>
    %5 = arith.addf %2, %4 : vector<8x96xf32>
    %cst_5 = arith.constant 0.000000e+00 : f32
    %6 = vector.broadcast %cst_5 : f32 to vector<8x96xf32>
    %7 = arith.maximumf %5, %6 : vector<8x96xf32>
    %c0_6 = arith.constant 0 : index
    %c0_7 = arith.constant 0 : index
    %8 = vector.load %arg3[%c0_6, %c0_7] : memref<96x96xf32, #tpu.memory_space<vmem>>, vector<96x96xf32>
    %cst_8 = arith.constant dense<0.000000e+00> : vector<8x96xf32>
    %9 = tpu.matmul %7, %8, %cst_8 {dimension_numbers = #tpu.dot_dimension_numbers<[1], [0], [0], [1], [0, 0, 1, 1], [], []>} : vector<8x96xf32>, vector<96x96xf32>, vector<8x96xf32> -> vector<8x96xf32>
    %c0_9 = arith.constant 0 : index
    %c0_10 = arith.constant 0 : index
    %10 = vector.load %arg8[%c0_9, %c0_10] : memref<1x96xf32, #tpu.memory_space<vmem>>, vector<1x96xf32>
    %11 = vector.broadcast %10 : vector<1x96xf32> to vector<8x96xf32>
    %12 = arith.addf %9, %11 : vector<8x96xf32>
    %cst_11 = arith.constant 0.000000e+00 : f32
    %13 = vector.broadcast %cst_11 : f32 to vector<8x96xf32>
    %14 = arith.maximumf %12, %13 : vector<8x96xf32>
    %c0_12 = arith.constant 0 : index
    %c0_13 = arith.constant 0 : index
    %15 = vector.load %arg4[%c0_12, %c0_13] : memref<96x96xf32, #tpu.memory_space<vmem>>, vector<96x96xf32>
    %cst_14 = arith.constant dense<0.000000e+00> : vector<8x96xf32>
    %16 = tpu.matmul %14, %15, %cst_14 {dimension_numbers = #tpu.dot_dimension_numbers<[1], [0], [0], [1], [0, 0, 1, 1], [], []>} : vector<8x96xf32>, vector<96x96xf32>, vector<8x96xf32> -> vector<8x96xf32>
    %c0_15 = arith.constant 0 : index
    %c0_16 = arith.constant 0 : index
    %17 = vector.load %arg9[%c0_15, %c0_16] : memref<1x96xf32, #tpu.memory_space<vmem>>, vector<1x96xf32>
    %18 = vector.broadcast %17 : vector<1x96xf32> to vector<8x96xf32>
    %19 = arith.addf %16, %18 : vector<8x96xf32>
    %cst_17 = arith.constant 0.000000e+00 : f32
    %20 = vector.broadcast %cst_17 : f32 to vector<8x96xf32>
    %21 = arith.maximumf %19, %20 : vector<8x96xf32>
    %c0_18 = arith.constant 0 : index
    %c0_19 = arith.constant 0 : index
    %22 = vector.load %arg5[%c0_18, %c0_19] : memref<96x32xf32, #tpu.memory_space<vmem>>, vector<96x32xf32>
    %cst_20 = arith.constant dense<0.000000e+00> : vector<8x32xf32>
    %23 = tpu.matmul %21, %22, %cst_20 {dimension_numbers = #tpu.dot_dimension_numbers<[1], [0], [0], [1], [0, 0, 1, 1], [], []>} : vector<8x96xf32>, vector<96x32xf32>, vector<8x32xf32> -> vector<8x32xf32>
    %c0_21 = arith.constant 0 : index
    %c0_22 = arith.constant 0 : index
    %24 = vector.load %arg10[%c0_21, %c0_22] : memref<1x32xf32, #tpu.memory_space<vmem>>, vector<1x32xf32>
    %25 = vector.broadcast %24 : vector<1x32xf32> to vector<8x32xf32>
    %26 = arith.addf %23, %25 : vector<8x32xf32>
    %cst_23 = arith.constant 0.000000e+00 : f32
    %27 = vector.broadcast %cst_23 : f32 to vector<8x32xf32>
    %28 = arith.maximumf %26, %27 : vector<8x32xf32>
    %c0_24 = arith.constant 0 : index
    %c0_25 = arith.constant 0 : index
    %29 = vector.load %arg6[%c0_24, %c0_25] : memref<32x4xf32, #tpu.memory_space<vmem>>, vector<32x4xf32>
    %cst_26 = arith.constant dense<0.000000e+00> : vector<8x4xf32>
    %30 = tpu.matmul %28, %29, %cst_26 {dimension_numbers = #tpu.dot_dimension_numbers<[1], [0], [0], [1], [0, 0, 1, 1], [], []>} : vector<8x32xf32>, vector<32x4xf32>, vector<8x4xf32> -> vector<8x4xf32>
    %c0_27 = arith.constant 0 : index
    %c0_28 = arith.constant 0 : index
    %31 = vector.load %arg11[%c0_27, %c0_28] : memref<1x4xf32, #tpu.memory_space<vmem>>, vector<1x4xf32>
    %32 = vector.broadcast %31 : vector<1x4xf32> to vector<8x4xf32>
    %33 = arith.addf %30, %32 : vector<8x4xf32>
    %c0_29 = arith.constant 0 : index
    %c0_30 = arith.constant 0 : index
    %34 = vector.load %arg12[%c0_29, %c0_30] : memref<8x4xf32, #tpu.memory_space<vmem>>, vector<8x4xf32>
    tpu.vector_store %arg12[%c0_29, %c0_30], %33 {strides = array<i32>} : memref<8x4xf32, #tpu.memory_space<vmem>>, vector<8x4xf32>,
    return
  }
  func.func @transform_0(%arg0: i32) -> (i32, i32) {
    %c0_i32 = arith.constant 0 : i32
    %c0_i32_0 = arith.constant 0 : i32
    return %arg0, %c0_i32 : i32, i32
  }
  func.func @transform_1(%arg0: i32) -> (i32, i32) {
    %c0_i32 = arith.constant 0 : i32
    %c0_i32_0 = arith.constant 0 : i32
    %c0_i32_1 = arith.constant 0 : i32
    return %c0_i32, %c0_i32_0 : i32, i32
  }
  func.func @transform_2(%arg0: i32) -> (i32, i32) {
    %c0_i32 = arith.constant 0 : i32
    %c0_i32_0 = arith.constant 0 : i32
    %c0_i32_1 = arith.constant 0 : i32
    return %c0_i32, %c0_i32_0 : i32, i32
  }
  func.func @transform_3(%arg0: i32) -> (i32, i32) {
    %c0_i32 = arith.constant 0 : i32
    %c0_i32_0 = arith.constant 0 : i32
    %c0_i32_1 = arith.constant 0 : i32
    return %c0_i32, %c0_i32_0 : i32, i32
  }
  func.func @transform_4(%arg0: i32) -> (i32, i32) {
    %c0_i32 = arith.constant 0 : i32
    %c0_i32_0 = arith.constant 0 : i32
    %c0_i32_1 = arith.constant 0 : i32
    return %c0_i32, %c0_i32_0 : i32, i32
  }
  func.func @transform_5(%arg0: i32) -> (i32, i32) {
    %c0_i32 = arith.constant 0 : i32
    %c0_i32_0 = arith.constant 0 : i32
    %c0_i32_1 = arith.constant 0 : i32
    return %c0_i32, %c0_i32_0 : i32, i32
  }
  func.func @transform_6(%arg0: i32) -> (i32, i32) {
    %c0_i32 = arith.constant 0 : i32
    %c0_i32_0 = arith.constant 0 : i32
    %c0_i32_1 = arith.constant 0 : i32
    return %c0_i32, %c0_i32_0 : i32, i32
  }
  func.func @transform_7(%arg0: i32) -> (i32, i32) {
    %c0_i32 = arith.constant 0 : i32
    %c0_i32_0 = arith.constant 0 : i32
    %c0_i32_1 = arith.constant 0 : i32
    return %c0_i32, %c0_i32_0 : i32, i32
  }
  func.func @transform_8(%arg0: i32) -> (i32, i32) {
    %c0_i32 = arith.constant 0 : i32
    %c0_i32_0 = arith.constant 0 : i32
    %c0_i32_1 = arith.constant 0 : i32
    return %c0_i32, %c0_i32_0 : i32, i32
  }
  func.func @transform_9(%arg0: i32) -> (i32, i32) {
    %c0_i32 = arith.constant 0 : i32
    %c0_i32_0 = arith.constant 0 : i32
    %c0_i32_1 = arith.constant 0 : i32
    return %c0_i32, %c0_i32_0 : i32, i32
  }
  func.func @transform_10(%arg0: i32) -> (i32, i32) {
    %c0_i32 = arith.constant 0 : i32
    %c0_i32_0 = arith.constant 0 : i32
    %c0_i32_1 = arith.constant 0 : i32
    return %c0_i32, %c0_i32_0 : i32, i32
  }
  func.func @transform_11(%arg0: i32) -> (i32, i32) {
    %c0_i32 = arith.constant 0 : i32
    %c0_i32_0 = arith.constant 0 : i32
    return %arg0, %c0_i32 : i32, i32
  }
}

</mosaic_0001>

<bundles_post_ra>
// kernel: network_forward.1
= control target key start
LH: loop header
LB: loop body
LE: loop exit
PB: predicated region body
PF: predicated region fallthrough
CT: control target
= control target key end

     0   :  { %16 = vsyncpa [#allocation3], 0  ;;  %s773_s17 = smov [#allocation2]   ;;  %s1028_s0 = inlined_call_operand.vmem [shape: f32[8,40], index: 0, kind: input, shape index: {}]   ;;  %s1029_s1 = inlined_call_operand.hbm [shape: f32[40,96], index: 1, kind: input, shape index: {}]   ;;  %s1030_s2 = inlined_call_operand.vmem [shape: f32[96,96], index: 2, kind: input, shape index: {}]   ;;  %s1031_s3 = inlined_call_operand.vmem [shape: f32[96,96], index: 3, kind: input, shape index: {}]   ;;  %s1032_s4 = inlined_call_operand.vmem [shape: f32[96,32], index: 4, kind: input, shape index: {}]   ;;  %s1033_s5 = inlined_call_operand.vmem [shape: f32[32,4], index: 5, kind: input, shape index: {}]   ;;  %s1034_s6 = inlined_call_operand.vmem [shape: f32[1,96], index: 6, kind: input, shape index: {}]   ;;  %s1035_s7 = inlined_call_operand.vmem [shape: f32[1,96], index: 7, kind: input, shape index: {}]   ;;  %s1036_s8 = inlined_call_operand.vmem [shape: f32[1,96], index: 8, kind: input, shape index: {}]   ;;  %s1037_s9 = inlined_call_operand.vmem [shape: f32[1,32], index: 9, kind: input, shape index: {}]   ;;  %s1038_s10 = inlined_call_operand.vmem [shape: f32[1,4], index: 10, kind: input, shape index: {}]   ;;  %s1039_s11 = inlined_call_operand.vmem [shape: f32[8,4], index: 11, kind: output, shape index: {}]  }
   0x1   :  { %s24_s18 = sshll.u32 %s773_s17, 4  ;;  %s749_s21 = scalar_lea.hbm %s1029_s1, 640  ;;  %s25_s18 = int_to_ptr.vmem [resolvable:$true] %s24_s18 }
   0x2   :  { %p750_p0 = scmp.ne.s32.totalorder %s1029_s1, %s749_s21  ;;  %p753_p1 = scmp.lt.u32.totalorder %s749_s21, %s1029_s1 }
   0x4   :  { %p755_p2 = pnand %p753_p1, %p750_p0 }
   0x6   :  { %758 = shalt.err (!%p755_p2)
}
   0x7   :  { %s759_s26 = scalar_lea.vmem %s25_s18, 640  ;;  %p764_p4 = scmp.lt.s32.totalorder %s25_s18, %s25_s18 }
   0x8   :  { %p760_p3 = scmp.ne.s32.totalorder %s25_s18, %s759_s26  ;;  %p765_p5 = scmp.lt.s32.totalorder %s759_s26, %s759_s26 }
   0xa   :  { %p766_p6 = por %p765_p5, %p764_p4 }
   0xc   :  { %p767_p7 = pnand %p766_p6, %p760_p3 }
   0xe   :  { %770 = shalt.err (!%p767_p7)
}
   0xf   :  { %s774_s27 = smov 128   ;;  %s775_s28 = smov 8  }
  0x10   :  { %30 = dma.hbm_to_vmem [thread:$0]  %s1029_s1, 640, %s25_s18, [#allocation3], %s774_s27, %s774_s27, %s775_s28  }
  0x11   :  { %771 = dma.done.wait [#allocation3], 640  }
  0x12   :  { %772 = vsyncadd [#allocation3], 4294966656  ;;  %v776_v0 = vmov 0.0|0.0   ;;  %vm777_vm0 = vmmov 0   ;;  %v778_v1 = vmov 0.0   ;;  %v53_v2 = vld [vmem:[#allocation2] sm:$0xff] }
  0x13   :  { %677 = vmatprep.subr.bf16.mxu0 %v776_v0  ;;  %582 = vmatprep.mubr.msk.f32.mxu0 %vm777_vm0, %v778_v1  ;;  %v54_v3 = vld [vmem:[#allocation2 + $0x8] sm:$0xff]  ;;  %v55_v4 = vld [vmem:[#allocation2 + $0x10] sm:$0xff]  ;;  %v56_v6 = vld [vmem:[#allocation2 + $0x18] sm:$0xff]  ;;  %vm65_vm1 = vcmask 326656   ;;  %vm159_vm2 = vcmask 785408   ;;  %vm431_vm3 = vcmask 261120  }
  0x14   :  { %683 = vmatprep.subr.bf16.mxu1 %v776_v0  ;;  %609 = vmatprep.mubr.msk.f32.mxu1 %vm777_vm0, %v778_v1  ;;  %v678_v5 = vpack.c.bf16 %v54_v3, %v53_v2  ;;  %v140_v7 = vld [vmem:[%s1030_s2] sm:$0xff]  ;;  %v141_v8 = vld [vmem:[%s1030_s2 + $0x8] sm:$0xff]  ;;  %v142_v9 = vld [vmem:[%s1030_s2 + $0x10] sm:$0xff]  ;;  %v681_v10 = vpack.c.bf16 %v56_v6, %v55_v4  ;;  %vm505_vm4 = vcmask 31744  }
  0x15   :  { %v684_v11 = vpack.c.bf16 %v141_v8, %v140_v7  ;;  %v143_v12 = vld [vmem:[%s1030_s2 + $0x18] sm:$0xff]  ;;  %v144_v14 = vld [vmem:[%s1030_s2 + $0x20] sm:$0xff]  ;;  %v145_v15 = vld [vmem:[%s1030_s2 + $0x28] sm:$0xff] }
  0x16   :  { %679 = vmatpush3.bf16.msra.mxu0 %v678_v5  ;;  %v687_v13 = vpack.c.bf16 %v143_v12, %v142_v9  ;;  %v57_v16 = vld [vmem:[#allocation2 + $0x20] sm:$0xff]  ;;  %v690_v18 = vpack.c.bf16 %v145_v15, %v144_v14  ;;  %v146_v19 = vld [vmem:[%s1030_s2 + $0x30] sm:$0xff]  ;;  %v147_v20 = vld [vmem:[%s1030_s2 + $0x38] sm:$0xff] }
  0x17   :  { %680 = vmatprep.subr.bf16.mxu0 %v776_v0  ;;  %685 = vmatpush3.bf16.msra.mxu1 %v684_v11  ;;  %v52_v17 = vld [vmem:[%s1028_s0] sm:$0xff]  ;;  %v693_v21 = vpack.c.bf16 %v147_v20, %v146_v19  ;;  %v149_v23 = vld [vmem:[%s1030_s2 + $0x48] sm:$0xff]  ;;  %v150_v25 = vld [vmem:[%s1030_s2 + $0x50] sm:$0xff] }
  0x18   :  { %686 = vmatprep.subr.bf16.mxu1 %v776_v0  ;;  %v148_v22 = vld [vmem:[%s1030_s2 + $0x40] sm:$0xff]  ;;  %v151_v26 = vld [vmem:[%s1030_s2 + $0x58] sm:$0xff]  ;;  %v235_v29 = vld [vmem:[%s1031_s3 + $0x8] sm:$0xff] }
  0x19   :  { %v696_v24 = vpack.c.bf16 %v149_v23, %v148_v22  ;;  %v699_v27 = vpack.c.bf16 %v151_v26, %v150_v25  ;;  %v234_v28 = vld [vmem:[%s1031_s3] sm:$0xff]  ;;  %v236_v30 = vld [vmem:[%s1031_s3 + $0x10] sm:$0xff]  ;;  %v237_v32 = vld [vmem:[%s1031_s3 + $0x18] sm:$0xff] }
  0x1a   :  { %682 = vmatpush3.bf16.msra.mxu0 %v681_v10  ;;  %v702_v31 = vpack.c.bf16 %v235_v29, %v234_v28  ;;  %v705_v33 = vpack.c.bf16 %v237_v32, %v236_v30  ;;  %v238_v34 = vld [vmem:[%s1031_s3 + $0x20] sm:$0xff]  ;;  %v239_v35 = vld [vmem:[%s1031_s3 + $0x28] sm:$0xff]  ;;  %v240_v37 = vld [vmem:[%s1031_s3 + $0x30] sm:$0xff] }
  0x1b   :  { %580 = vmatprep.subr.mxu0 %v778_v1  ;;  %688 = vmatpush3.bf16.msra.mxu1 %v687_v13  ;;  %v708_v36 = vpack.c.bf16 %v239_v35, %v238_v34  ;;  %v241_v38 = vld [vmem:[%s1031_s3 + $0x38] sm:$0xff]  ;;  %v242_v40 = vld [vmem:[%s1031_s3 + $0x40] sm:$0xff]  ;;  %v243_v41 = vld [vmem:[%s1031_s3 + $0x48] sm:$0xff] }
  0x1c   :  { %689 = vmatprep.subr.bf16.mxu1 %v776_v0  ;;  %v711_v39 = vpack.c.bf16 %v241_v38, %v240_v37  ;;  %v714_v42 = vpack.c.bf16 %v243_v41, %v242_v40  ;;  %v512_v43 = vld [vmem:[%s1034_s6] ss:$0 sm:$0xff]  ;;  %v244_v48 = vld [vmem:[%s1031_s3 + $0x50] sm:$0xff]  ;;  %v245_v49 = vld [vmem:[%s1031_s3 + $0x58] sm:$0xff] }
  0x1d   :  { %v717_v50 = vpack.c.bf16 %v245_v49, %v244_v48  ;;  %v327_v51 = vld [vmem:[%s1032_s4] sm:$0xff]  ;;  %v328_v52 = vld [vmem:[%s1032_s4 + $0x8] sm:$0xff]  ;;  %v329_v53 = vld [vmem:[%s1032_s4 + $0x10] sm:$0xff] }
  0x1e   :  { %581 = vmatpush3.msra.mxu0 %v57_v16  ;;  %v720_v54 = vpack.c.bf16 %v328_v52, %v327_v51  ;;  %v330_v55 = vld [vmem:[%s1032_s4 + $0x18] sm:$0xff]  ;;  %v331_v57 = vld [vmem:[%s1032_s4 + $0x20] sm:$0xff]  ;;  %v332_v58 = vld [vmem:[%s1032_s4 + $0x28] sm:$0xff] }
  0x1f   :  { %583 = vmatmul.mubr.msk.f32.vlgmr.msra.gmra.mrb[0].mxu0 %vm65_vm1, %v52_v17  ;;  %701 = vmatprep.subr.bf16.mxu0 %v776_v0  ;;  %v723_v56 = vpack.c.bf16 %v330_v55, %v329_v53  ;;  %v726_v59 = vpack.c.bf16 %v332_v58, %v331_v57  ;;  %v333_v60 = vld [vmem:[%s1032_s4 + $0x30] sm:$0xff]  ;;  %v334_v61 = vld [vmem:[%s1032_s4 + $0x38] sm:$0xff]  ;;  %v335_v63 = vld [vmem:[%s1032_s4 + $0x40] sm:$0xff] }
  0x20   :  { %691 = vmatpush3.bf16.msra.mxu1 %v690_v18  ;;  %636 = vmatprep.mubr.msk.f32.mxu0 %vm777_vm0, %v778_v1  ;;  %v729_v62 = vpack.c.bf16 %v334_v61, %v333_v60  ;;  %v336_v2 = vld [vmem:[%s1032_s4 + $0x48] sm:$0xff]  ;;  %v514_v4 = vld [vmem:[%s1035_s7] ss:$0 sm:$0xff]  ;;  %v337_v9 = vld [vmem:[%s1032_s4 + $0x50] sm:$0xff] }
  0x21   :  { %692 = vmatprep.subr.bf16.mxu1 %v776_v0  ;;  %703 = vmatpush3.bf16.msra.mxu0 %v702_v31  ;;  %v732_v3 = vpack.c.bf16 %v336_v2, %v335_v63  ;;  %v338_v10 = vld [vmem:[%s1032_s4 + $0x58] sm:$0xff]  ;;  %v420_v12 = vld [vmem:[%s1033_s5] sm:$0xff]  ;;  %v421_v13 = vld [vmem:[%s1033_s5 + $0x8] sm:$0xff] }
  0x22   :  { %704 = vmatprep.subr.bf16.mxu0 %v776_v0  ;;  %v735_v11 = vpack.c.bf16 %v338_v10, %v337_v9  ;;  %v738_v14 = vpack.c.bf16 %v421_v13, %v420_v12  ;;  %v422_v19 = vld [vmem:[%s1033_s5 + $0x10] sm:$0xff]  ;;  %v423_v20 = vld [vmem:[%s1033_s5 + $0x18] sm:$0xff]  ;;  %v520_v26 = vld [vmem:[%s1038_s10] ss:$0 sm:$0xff] }
  0x24   :  { %694 = vmatpush3.bf16.msra.mxu1 %v693_v21  ;;  %v741_v21 = vpack.c.bf16 %v423_v20, %v422_v19 }
  0x25   :  { %695 = vmatprep.subr.bf16.mxu1 %v776_v0  ;;  %706 = vmatpush3.bf16.msra.mxu0 %v705_v33 }
  0x26   :  { %707 = vmatprep.subr.bf16.mxu0 %v776_v0 }
  0x28   :  { %697 = vmatpush3.bf16.msra.mxu1 %v696_v24 }
  0x29   :  { %698 = vmatprep.subr.bf16.mxu1 %v776_v0  ;;  %709 = vmatpush3.bf16.msra.mxu0 %v708_v36 }
  0x2a   :  { %710 = vmatprep.subr.bf16.mxu0 %v776_v0 }
  0x2c   :  { %700 = vmatpush3.bf16.msra.mxu1 %v699_v27 }
  0x2d   :  { %719 = vmatprep.subr.bf16.mxu1 %v776_v0  ;;  %712 = vmatpush3.bf16.msra.mxu0 %v711_v39 }
  0x2e   :  { %713 = vmatprep.subr.bf16.mxu0 %v776_v0 }
  0x31   :  { %715 = vmatpush3.bf16.msra.mxu0 %v714_v42 }
  0x32   :  { %716 = vmatprep.subr.bf16.mxu0 %v776_v0 }
  0x35   :  { %718 = vmatpush3.bf16.msra.mxu0 %v717_v50 }
  0x36   :  { %737 = vmatprep.subr.bf16.mxu0 %v776_v0 }
  0xf2   :  { %v135_v44 = vpop.f32.mrb[0].mxu0 }
  0xf3   :  { %v136_v45 = vadd.f32 %v512_v43, %v135_v44  ;;  %v584_v46 = vpop.f32.mrb[1].mxu0 }
  0xf5   :  { %v139_v47 = vmax.f32 %v136_v45, 0.0 }
  0xf7   :  { %610 = vmatmul.mubr.msk.f32.vlgmr.msra.gmra.mrb[0].mxu1 %vm159_vm2, %v139_v47 }
  0xf8   :  { %663 = vmatprep.mubr.msk.f32.mxu1 %vm777_vm0, %v778_v1  ;;  %721 = vmatpush3.bf16.msra.mxu1 %v720_v54 }
  0xf9   :  { %722 = vmatprep.subr.bf16.mxu1 %v776_v0 }
  0xfc   :  { %724 = vmatpush3.bf16.msra.mxu1 %v723_v56 }
  0xfd   :  { %725 = vmatprep.subr.bf16.mxu1 %v776_v0 }
 0x100   :  { %727 = vmatpush3.bf16.msra.mxu1 %v726_v59 }
 0x101   :  { %728 = vmatprep.subr.bf16.mxu1 %v776_v0 }
 0x104   :  { %730 = vmatpush3.bf16.msra.mxu1 %v729_v62 }
 0x105   :  { %731 = vmatprep.subr.bf16.mxu1 %v776_v0 }
 0x108   :  { %733 = vmatpush3.bf16.msra.mxu1 %v732_v3 }
 0x109   :  { %734 = vmatprep.subr.bf16.mxu1 %v776_v0 }
 0x10c   :  { %736 = vmatpush3.bf16.msra.mxu1 %v735_v11 }
 0x1ca   :  { %v229_v5 = vpop.f32.mrb[0].mxu1 }
 0x1cb   :  { %v230_v6 = vadd.f32 %v514_v4, %v229_v5  ;;  %v611_v7 = vpop.f32.mrb[1].mxu1 }
 0x1cd   :  { %v233_v8 = vmax.f32 %v230_v6, 0.0 }
 0x1cf   :  { %637 = vmatmul.mubr.msk.f32.vlgmr.msra.gmra.mrb[2].mxu0 %vm159_vm2, %v233_v8 }
 0x1d0   :  { %674 = vmatprep.mubr.msk.f32.mxu0 %vm777_vm0, %v778_v1  ;;  %739 = vmatpush3.bf16.msra.mxu0 %v738_v14  ;;  %v516_v1 = vld [vmem:[%s1036_s8] ss:$0 sm:$0xff] }
 0x1d1   :  { %740 = vmatprep.subr.bf16.mxu0 %v776_v0  ;;  %v518_v0 = vld [vmem:[%s1037_s9] ss:$0 sm:$0xff] }
 0x1d4   :  { %742 = vmatpush3.bf16.msra.mxu0 %v741_v21 }
 0x2a2   :  { %v322_v15 = vpop.f32.mrb[2].mxu0 }
 0x2a3   :  { %v323_v16 = vadd.f32 %v516_v1, %v322_v15  ;;  %v638_v17 = vpop.f32.mrb[3].mxu0 }
 0x2a5   :  { %v326_v18 = vmax.f32 %v323_v16, 0.0 }
 0x2a7   :  { %664 = vmatmul.mubr.msk.f32.vlgmr.msra.gmra.mrb[2].mxu1 %vm159_vm2, %v326_v18 }
 0x37a   :  { %v415_v22 = vpop.f32.mrb[2].mxu1 }
 0x37b   :  { %v416_v23 = vadd.f32 %v518_v0, %v415_v22  ;;  %v665_v24 = vpop.f32.mrb[3].mxu1 }
 0x37d   :  { %v419_v25 = vmax.f32 %v416_v23, 0.0 }
 0x37f   :  { %675 = vmatmul.mubr.msk.f32.vlgmr.msra.gmra.mrb[4].mxu0 %vm431_vm3, %v419_v25 }
 0x452   :  { %v501_v27 = vpop.f32.mrb[4].mxu0 }
 0x453   :  { %v502_v28 = vadd.f32 %v520_v26, %v501_v27  ;;  %v676_v29 = vpop.f32.mrb[5].mxu0 }
 0x455   :  { %506 = vst.msk [vmem:[%s1039_s11] sm:$0xff] %vm505_vm4, %v502_v28 }
 0x456   :  { %511 = vsyncpa [#allocation3], 1 }

</bundles_post_ra>
